<compile_context>
chip_gen: v5e
topology: v5e:2x2
jax: 0.10.0
libtpu: 0.0.40
codegen_flags: <defaults>
</compile_context>

<pallas_src>
import functools

import jax
import jax.numpy as jnp
from jax.experimental import pallas as pl
from jax.experimental.pallas import tpu as pltpu


def _sdpa_dropout_kernel(q_ref, k_ref, v_ref, u_ref, o_ref,
                         *, inv_scale_factor, dropout_p):
    # Fold the 1/inv_scale into Q: (Bt, Lq, D) multiplies instead of (Bt, Lq, Lk).
    scale = jnp.asarray(1.0 / float(inv_scale_factor), dtype=q_ref.dtype)
    q = q_ref[...] * scale          # (Bt, Lq, D), native dtype
    k = k_ref[...]                  # (Bt, Lk, D)
    v = v_ref[...]                  # (Bt, Lk, Dv)

    # scores = (Q/s) @ K^T, MXU with f32 accumulation, operands in native dtype.
    s = jnp.einsum('bqd,bkd->bqk', q, k, preferred_element_type=jnp.float32)

    # Numerically stable softmax over the last dim.
    m = jnp.max(s, axis=-1, keepdims=True)
    e = jnp.exp(s - m)
    denom = jnp.sum(e, axis=-1, keepdims=True)

    if dropout_p <= 0.0:
        # No dropout: plain softmax.
        p_mat = e * (1.0 / denom)
    elif dropout_p >= 1.0:
        # Everything dropped.
        p_mat = jnp.zeros_like(e)
    else:
        # Inverted dropout with the keep-scale folded into the softmax
        # denominator:  softmax * keep / (1-p) == e * (1/(denom*(1-p))) masked.
        inv = 1.0 / (denom * jnp.float32(1.0 - dropout_p))
        keep = u_ref[...] >= jnp.float32(dropout_p)   # precomputed U[0,1) draws
        p_mat = jnp.where(keep, e * inv, jnp.float32(0.0))

    out = jnp.einsum('bqk,bkd->bqd', p_mat.astype(v.dtype), v,
                     preferred_element_type=jnp.float32)
    o_ref[...] = out.astype(o_ref.dtype)


def sdpa_dropout(query, key, value, *, inv_scale_factor=10, dropout_p=0.1,
                 rng_key=None, batch_block=None):
    """query: (B, Lq, D), key: (B, Lk, D), value: (B, Lk, Dv) -> (B, Lq, Dv)."""
    B, Lq, D = query.shape
    Bk, Lk, Dk = key.shape
    Bv, Lv, Dv = value.shape
    assert Dk == D and Lv == Lk and Bk == B and Bv == B

    # Multiple batch elements per grid step to amortize per-step overhead.
    if batch_block is None:
        batch_block = B
    assert B % batch_block == 0
    grid = (B // batch_block,)

    # Dropout uniforms generated outside the kernel (TPU hardware PRNG
    # primitives are not available in interpret mode).
    if rng_key is None:
        rng_key = jax.random.PRNGKey(0)
    if 0.0 < float(dropout_p) < 1.0:
        u = jax.random.uniform(rng_key, (B, Lq, Lk), dtype=jnp.float32)
    else:
        u = jnp.zeros((B, Lq, Lk), dtype=jnp.float32)

    kernel = functools.partial(_sdpa_dropout_kernel,
                               inv_scale_factor=inv_scale_factor,
                               dropout_p=float(dropout_p))

    return pl.pallas_call(
        kernel,
        out_shape=jax.ShapeDtypeStruct((B, Lq, Dv), query.dtype),
        grid=grid,
        in_specs=[
            pl.BlockSpec((batch_block, Lq, D), lambda b: (b, 0, 0)),
            pl.BlockSpec((batch_block, Lk, D), lambda b: (b, 0, 0)),
            pl.BlockSpec((batch_block, Lk, Dv), lambda b: (b, 0, 0)),
            pl.BlockSpec((batch_block, Lq, Lk), lambda b: (b, 0, 0)),
        ],
        out_specs=pl.BlockSpec((batch_block, Lq, Dv), lambda b: (b, 0, 0)),
        compiler_params=pltpu.CompilerParams(
            # No cross-iteration state (mask comes from an input), so the
            # batch axis is safely parallel (shards across v7x TensorCores).
            dimension_semantics=("parallel",)),
    )(query, key, value, u)


if __name__ == "__main__":
    # Small shapes consistent with the module's batched-matmul attention,
    # chosen lane-dense (last dim = 128) so stores are unmasked.
    B, Lq, Lk, D, Dv = 4, 16, 16, 128, 128

    k0, k1, k2, k3 = jax.random.split(jax.random.PRNGKey(0), 4)
    query = jax.random.normal(k0, (B, Lq, D), dtype=jnp.float32)
    key = jax.random.normal(k1, (B, Lk, D), dtype=jnp.float32)
    value = jax.random.normal(k2, (B, Lk, Dv), dtype=jnp.float32)

    out = sdpa_dropout(query, key, value,
                       inv_scale_factor=10, dropout_p=0.1, rng_key=k3)
    jax.block_until_ready(out)
    assert out.shape == (B, Lq, Dv)
    assert jnp.all(jnp.isfinite(out))
    print("KERNEL_OK")
</pallas_src>

<mosaic_0001>
module attributes {stable_mosaic.version = 11 : i64} {
  func.func @_sdpa_dropout_kernel(%arg0: i32, %arg1: memref<4x16x128xf32, #tpu.memory_space<vmem>>, %arg2: memref<4x16x128xf32, #tpu.memory_space<vmem>>, %arg3: memref<4x16x128xf32, #tpu.memory_space<vmem>>, %arg4: memref<4x16x16xf32, #tpu.memory_space<vmem>>, %arg5: memref<4x16x128xf32, #tpu.memory_space<vmem>>) attributes {dimension_semantics = [#tpu.dimension_semantics<parallel>], iteration_bounds = array<i64: 1>, scalar_prefetch = 0 : i64, scratch_operands = 0 : i64, tpu.core_type = #tpu.core_type<tc>, window_params = [{transform_indices = @transform_0, window_bounds = array<i64: 4, 16, 128>}, {transform_indices = @transform_1, window_bounds = array<i64: 4, 16, 128>}, {transform_indices = @transform_2, window_bounds = array<i64: 4, 16, 128>}, {transform_indices = @transform_3, window_bounds = array<i64: 4, 16, 16>}, {transform_indices = @transform_4, window_bounds = array<i64: 4, 16, 128>}]} {
    %c0 = arith.constant 0 : index
    %c0_0 = arith.constant 0 : index
    %c0_1 = arith.constant 0 : index
    %0 = vector.load %arg1[%c0, %c0_0, %c0_1] : memref<4x16x128xf32, #tpu.memory_space<vmem>>, vector<4x16x128xf32>
    %cst = arith.constant 1.000000e-01 : f32
    %1 = vector.broadcast %cst : f32 to vector<4x16x128xf32>
    %2 = arith.mulf %0, %1 : vector<4x16x128xf32>
    %c0_2 = arith.constant 0 : index
    %c0_3 = arith.constant 0 : index
    %c0_4 = arith.constant 0 : index
    %3 = vector.load %arg2[%c0_2, %c0_3, %c0_4] : memref<4x16x128xf32, #tpu.memory_space<vmem>>, vector<4x16x128xf32>
    %c0_5 = arith.constant 0 : index
    %c0_6 = arith.constant 0 : index
    %c0_7 = arith.constant 0 : index
    %4 = vector.load %arg3[%c0_5, %c0_6, %c0_7] : memref<4x16x128xf32, #tpu.memory_space<vmem>>, vector<4x16x128xf32>
    "tpu.trace_start"() <{level = 10 : i32, message = "bqd,bkd->bqk"}> : () -> ()
    %cst_8 = arith.constant dense<0.000000e+00> : vector<4x16x16xf32>
    %5 = tpu.matmul %2, %3, %cst_8 {dimension_numbers = #tpu.dot_dimension_numbers<[2], [2], [1], [1], [0, 0, 0, 1, 1, 1], [0], [0]>} : vector<4x16x128xf32>, vector<4x16x128xf32>, vector<4x16x16xf32> -> vector<4x16x16xf32>
    "tpu.trace_stop"() : () -> ()
    %cst_9 = arith.constant dense<0xFF800000> : vector<4x16xf32>
    %6 = vector.multi_reduction <maximumf>, %5, %cst_9 [2] : vector<4x16x16xf32> to vector<4x16xf32>
    %7 = vector.shape_cast %6 : vector<4x16xf32> to vector<4x16x1xf32>
    %8 = vector.broadcast %7 : vector<4x16x1xf32> to vector<4x16x16xf32>
    %9 = arith.subf %5, %8 : vector<4x16x16xf32>
    %10 = math.exp %9 : vector<4x16x16xf32>
    %cst_10 = arith.constant dense<0.000000e+00> : vector<4x16xf32>
    %11 = vector.multi_reduction <add>, %10, %cst_10 [2] : vector<4x16x16xf32> to vector<4x16xf32>
    %12 = vector.shape_cast %11 : vector<4x16xf32> to vector<4x16x1xf32>
    %cst_11 = arith.constant 0.899999976 : f32
    %13 = vector.broadcast %cst_11 : f32 to vector<4x16x1xf32>
    %14 = arith.mulf %12, %13 : vector<4x16x1xf32>
    %cst_12 = arith.constant 1.000000e+00 : f32
    %15 = vector.broadcast %cst_12 : f32 to vector<4x16x1xf32>
    %16 = arith.divf %15, %14 : vector<4x16x1xf32>
    %c0_13 = arith.constant 0 : index
    %c0_14 = arith.constant 0 : index
    %c0_15 = arith.constant 0 : index
    %17 = vector.load %arg4[%c0_13, %c0_14, %c0_15] : memref<4x16x16xf32, #tpu.memory_space<vmem>>, vector<4x16x16xf32>
    %cst_16 = arith.constant 1.000000e-01 : f32
    %18 = vector.broadcast %cst_16 : f32 to vector<4x16x16xf32>
    %19 = arith.cmpf oge, %17, %18 : vector<4x16x16xf32>
    %20 = vector.broadcast %16 : vector<4x16x1xf32> to vector<4x16x16xf32>
    %21 = arith.mulf %10, %20 : vector<4x16x16xf32>
    %cst_17 = arith.constant 0.000000e+00 : f32
    %22 = vector.broadcast %cst_17 : f32 to vector<4x16x16xf32>
    %23 = arith.select %19, %21, %22 : vector<4x16x16xi1>, vector<4x16x16xf32>
    "tpu.trace_start"() <{level = 10 : i32, message = "bqk,bkd->bqd"}> : () -> ()
    %cst_18 = arith.constant dense<0.000000e+00> : vector<4x16x128xf32>
    %24 = tpu.matmul %23, %4, %cst_18 {dimension_numbers = #tpu.dot_dimension_numbers<[2], [1], [1], [2], [0, 0, 0, 1, 1, 2], [0], [0]>} : vector<4x16x16xf32>, vector<4x16x128xf32>, vector<4x16x128xf32> -> vector<4x16x128xf32>
    "tpu.trace_stop"() : () -> ()
    %c0_19 = arith.constant 0 : index
    %c0_20 = arith.constant 0 : index
    %c0_21 = arith.constant 0 : index
    %25 = vector.load %arg5[%c0_19, %c0_20, %c0_21] : memref<4x16x128xf32, #tpu.memory_space<vmem>>, vector<4x16x128xf32>
    tpu.vector_store %arg5[%c0_19, %c0_20, %c0_21], %24 {strides = array<i32>} : memref<4x16x128xf32, #tpu.memory_space<vmem>>, vector<4x16x128xf32>,
    return
  }
  func.func @transform_0(%arg0: i32) -> (i32, i32, i32) {
    %c0_i32 = arith.constant 0 : i32
    %c0_i32_0 = arith.constant 0 : i32
    %c0_i32_1 = arith.constant 0 : i32
    return %arg0, %c0_i32, %c0_i32_0 : i32, i32, i32
  }
  func.func @transform_1(%arg0: i32) -> (i32, i32, i32) {
    %c0_i32 = arith.constant 0 : i32
    %c0_i32_0 = arith.constant 0 : i32
    %c0_i32_1 = arith.constant 0 : i32
    return %arg0, %c0_i32, %c0_i32_0 : i32, i32, i32
  }
  func.func @transform_2(%arg0: i32) -> (i32, i32, i32) {
    %c0_i32 = arith.constant 0 : i32
    %c0_i32_0 = arith.constant 0 : i32
    %c0_i32_1 = arith.constant 0 : i32
    return %arg0, %c0_i32, %c0_i32_0 : i32, i32, i32
  }
  func.func @transform_3(%arg0: i32) -> (i32, i32, i32) {
    %c0_i32 = arith.constant 0 : i32
    %c0_i32_0 = arith.constant 0 : i32
    %c0_i32_1 = arith.constant 0 : i32
    return %arg0, %c0_i32, %c0_i32_0 : i32, i32, i32
  }
  func.func @transform_4(%arg0: i32) -> (i32, i32, i32) {
    %c0_i32 = arith.constant 0 : i32
    %c0_i32_0 = arith.constant 0 : i32
    %c0_i32_1 = arith.constant 0 : i32
    return %arg0, %c0_i32, %c0_i32_0 : i32, i32, i32
  }
}

</mosaic_0001>

<bundles_post_ra>
// kernel: tpu_custom_call.1
= control target key start
LH: loop header
LB: loop body
LE: loop exit
PB: predicated region body
PF: predicated region fallthrough
CT: control target
= control target key end

     0   :  { %9 = vsyncpa [#allocation3], 0  ;;  %s971_s0 = inlined_call_operand.hbm [shape: f32[4,16,128], index: 0, kind: input, shape index: {}]   ;;  %s972_s1 = inlined_call_operand.hbm [shape: f32[4,16,128], index: 1, kind: input, shape index: {}]   ;;  %s973_s2 = inlined_call_operand.hbm [shape: f32[4,16,128], index: 2, kind: input, shape index: {}]   ;;  %s974_s3 = inlined_call_operand.hbm [shape: f32[4,16,16], index: 3, kind: input, shape index: {}]   ;;  %s975_s4 = inlined_call_operand.hbm [shape: f32[4,16,128], index: 4, kind: output, shape index: {}]  }
   0x1   :  { %10 = vsyncpa [#allocation6], 0 }
   0x2   :  { %11 = vsyncpa [#allocation9], 0 }
   0x3   :  { %12 = vsyncpa [#allocation4], 0  ;;  %s30_s17 = sshll.u32 %s972_s1, 4  ;;  %s758_s18 = smov [#allocation5]   ;;  %s31_s17 = int_to_ptr.hbm [resolvable:$true] %s30_s17 }
   0x4   :  { %s32_s19 = sshll.u32 %s758_s18, 4  ;;  %s17_s22 = sshll.u32 %s971_s0, 4  ;;  %s33_s19 = int_to_ptr.vmem [resolvable:$true] %s32_s19  ;;  %s18_s22 = int_to_ptr.hbm [resolvable:$true] %s17_s22 }
   0x5   :  { %s759_s23 = smov 128   ;;  %s760_s24 = smov 8  }
   0x6   :  { %38 = dma.hbm_to_vmem [thread:$0]  %s31_s17, 1024, %s33_s19, [#allocation6], %s759_s23, %s759_s23, %s760_s24  }
   0x7   :  { %s761_s25 = smov [#allocation2]   ;;  %s43_s1 = sshll.u32 %s973_s2, 4  ;;  %s44_s1 = int_to_ptr.hbm [resolvable:$true] %s43_s1 }
   0x8   :  { %s19_s26 = sshll.u32 %s761_s25, 4  ;;  %s56_s30 = sshll.u32 %s974_s3, 4  ;;  %s20_s26 = int_to_ptr.vmem [resolvable:$true] %s19_s26  ;;  %s57_s30 = int_to_ptr.hbm [resolvable:$true] %s56_s30 }
   0x9   :  { %25 = dma.hbm_to_vmem [thread:$0]  %s18_s22, 1024, %s20_s26, [#allocation3], %s759_s23, %s759_s23, %s760_s24  }
   0xa   :  { %s762_s5 = smov [#allocation7]   ;;  %s763_s7 = smov [#allocation8]  }
   0xb   :  { %s45_s6 = sshll.u32 %s762_s5, 4  ;;  %s58_s2 = sshll.u32 %s763_s7, 4  ;;  %s46_s6 = int_to_ptr.vmem [resolvable:$true] %s45_s6  ;;  %s59_s2 = int_to_ptr.vmem [resolvable:$true] %s58_s2 }
   0xc   :  { %51 = dma.hbm_to_vmem [thread:$0]  %s44_s1, 1024, %s46_s6, [#allocation6], %s759_s23, %s759_s23, %s760_s24  }
   0xd   :  { %64 = dma.hbm_to_vmem [thread:$0]  %s57_s30, 1024, %s59_s2, [#allocation9], %s759_s23, %s759_s23, %s760_s24  }
   0xe   :  { %750 = dma.done.wait [#allocation3], 1024  }
   0xf   :  { %751 = vsyncadd [#allocation3], 4294966272 }
  0x10   :  { %752 = dma.done.wait [#allocation6], 2048  }
  0x11   :  { %753 = vsyncadd [#allocation6], 4294965248 }
  0x12   :  { %754 = dma.done.wait [#allocation9], 1024  }
  0x13   :  { %755 = vsyncadd [#allocation9], 4294966272  ;;  %v98_v0 = vld [vmem:[#allocation5 + $0x8] sm:$0xff]  ;;  %v97_v2 = vld [vmem:[#allocation5] sm:$0xff]  ;;  %vm205_vm0 = vcmask 130048   ;;  %s764_s3 = smov [#allocation10]  }
  0x14   :  { %v102_v1 = vld [vmem:[#allocation5 + $0x28] sm:$0xff]  ;;  %127 = vmatpush.xpose.msra.mxu0 %v98_v0  ;;  %v81_v3 = vld [vmem:[#allocation2] sm:$0xff]  ;;  %v100_v6 = vld [vmem:[#allocation5 + $0x18] sm:$0xff]  ;;  %s566_s8 = sshll.u32 %s764_s3, 4  ;;  %s568_s11 = sshll.u32 %s975_s4, 4  ;;  %s567_s8 = int_to_ptr.vmem [resolvable:$true] %s566_s8  ;;  %s569_s11 = int_to_ptr.hbm [resolvable:$true] %s568_s11 }
  0x15   :  { %173 = vmatpush.xpose.msra.mxu2 %v102_v1  ;;  %v85_v4 = vld [vmem:[#allocation2 + $0x20] sm:$0xff]  ;;  %v104_v7 = vld [vmem:[#allocation5 + $0x38] sm:$0xff]  ;;  %v89_v8 = vmul.f32 0.1, %v81_v3  ;;  %150 = vmatpush.xpose.msra.mxu1 %v100_v6  ;;  %v83_v9 = vld [vmem:[#allocation2 + $0x10] sm:$0xff] }
  0x16   :  { %v101_v5 = vld [vmem:[#allocation5 + $0x20] sm:$0xff]  ;;  %196 = vmatpush.xpose.msra.mxu3 %v104_v7  ;;  %v93_v10 = vmul.f32 0.1, %v85_v4  ;;  %v99_v11 = vld [vmem:[#allocation5 + $0x10] sm:$0xff]  ;;  %v91_v14 = vmul.f32 0.1, %v83_v9 }
  0x17   :  { %v103_v12 = vld [vmem:[#allocation5 + $0x30] sm:$0xff]  ;;  %v86_v16 = vld [vmem:[#allocation2 + $0x28] sm:$0xff]  ;;  %v84_v18 = vld [vmem:[#allocation2 + $0x18] sm:$0xff] }
  0x18   :  { %v87_v13 = vld [vmem:[#allocation2 + $0x30] sm:$0xff]  ;;  %128 = vmatpush.xpose.msra.mxu0 %v97_v2  ;;  %v82_v17 = vld [vmem:[#allocation2 + $0x8] sm:$0xff]  ;;  %v88_v19 = vld [vmem:[#allocation2 + $0x38] sm:$0xff]  ;;  %v94_v20 = vmul.f32 0.1, %v86_v16 }
  0x19   :  { %174 = vmatpush.xpose.msra.mxu2 %v101_v5  ;;  %v95_v15 = vmul.f32 0.1, %v87_v13  ;;  %151 = vmatpush.xpose.msra.mxu1 %v99_v11  ;;  %v90_v21 = vmul.f32 0.1, %v82_v17  ;;  %v92_v22 = vmul.f32 0.1, %v84_v18 }
  0x1a   :  { %197 = vmatpush.xpose.msra.mxu3 %v103_v12  ;;  %v96_v23 = vmul.f32 0.1, %v88_v19  ;;  %v106_v16 = vld [vmem:[#allocation7 + $0x8] sm:$0xff]  ;;  %v105_v17 = vld [vmem:[#allocation7] sm:$0xff] }
  0x1b   :  { %129 = vmatmul.f32.vlgmr.msra.gmra.mxu0 %v89_v8  ;;  %v110_v18 = vld [vmem:[#allocation7 + $0x28] sm:$0xff]  ;;  %v109_v19 = vld [vmem:[#allocation7 + $0x20] sm:$0xff] }
  0x1c   :  { %175 = vmatmul.f32.vlgmr.msra.gmra.mxu2 %v93_v10  ;;  %152 = vmatmul.f32.vlgmr.msra.gmra.mxu1 %v91_v14 }
  0x1d   :  { %198 = vmatmul.f32.vlgmr.msra.gmra.mxu3 %v95_v15  ;;  %458 = vmatpush.msrb.mxu0 %v106_v16 }
  0x1e   :  { %516 = vmatpush.msrb.mxu2 %v110_v18 }
  0x1f   :  { %459 = vmatpush.msrb.mxu0 %v105_v17 }
  0x20   :  { %517 = vmatpush.msrb.mxu2 %v109_v19 }
  0x23   :  { %132 = vmatmul.f32.gmra.mxu0 %v90_v21 }
  0x24   :  { %178 = vmatmul.f32.gmra.mxu2 %v94_v20  ;;  %155 = vmatmul.f32.gmra.mxu1 %v92_v22  ;;  %v112_v22 = vld [vmem:[#allocation7 + $0x38] sm:$0xff] }
  0x25   :  { %201 = vmatmul.f32.gmra.mxu3 %v96_v23  ;;  %v108_v23 = vld [vmem:[#allocation7 + $0x18] sm:$0xff] }
  0x26   :  { %545 = vmatpush.msrb.mxu3 %v112_v22  ;;  %487 = vmatpush.msrb.mxu1 %v108_v23 }
  0x98   :  { %v130_v24 = vpop.f32.mrf.mxu0 }
  0x99   :  { %v206_v25 = vsel %vm205_vm0, %v130_v24, -inf  ;;  %v153_v26 = vpop.f32.mrf.mxu1 }
  0x9a   :  { %207 = vmax.xlane.f32.xlu1 %v206_v25  ;;  %v212_v29 = vsel %vm205_vm0, %v153_v26, -inf  ;;  %v107_v25 = vld [vmem:[#allocation7 + $0x10] sm:$0xff] }
  0x9b   :  { %488 = vmatpush.msrb.mxu1 %v107_v25 }
  0x9f   :  { %v176_v27 = vpop.f32.mrf.mxu2 }
  0xa0   :  { %v218_v28 = vsel %vm205_vm0, %v176_v27, -inf  ;;  %v199_v30 = vpop.f32.mrf.mxu3  ;;  %v133_v36 = vpop.f32.mrf.mxu0 }
  0xa1   :  { %219 = vmax.xlane.f32.xlu0 %v218_v28  ;;  %v156_v31 = vpop.f32.mrf.mxu1  ;;  %v224_v32 = vsel %vm205_vm0, %v199_v30, -inf  ;;  %v209_v39 = vsel %vm205_vm0, %v133_v36, -inf }
  0xa2   :  { %213 = vmax.xlane.f32.xlu1 %v212_v29  ;;  %v215_v35 = vsel %vm205_vm0, %v156_v31, -inf }
  0xa7   :  { %v179_v33 = vpop.f32.mrf.mxu2 }
  0xa8   :  { %v221_v34 = vsel %vm205_vm0, %v179_v33, -inf  ;;  %v202_v37 = vpop.f32.mrf.mxu3 }
  0xa9   :  { %225 = vmax.xlane.f32.xlu0 %v224_v32  ;;  %222 = vmax.xlane.f32.xlu2 %v221_v34  ;;  %v227_v38 = vsel %vm205_vm0, %v202_v37, -inf }
  0xaa   :  { %216 = vmax.xlane.f32.xlu1 %v215_v35 }
  0xb1   :  { %228 = vmax.xlane.f32.xlu2 %v227_v38  ;;  %210 = vmax.xlane.f32.xlu0 %v209_v39 }
 0x10d   :  { %v208_v40 = vpop.xlane.xlu1 %207 }
 0x10e   :  { %v230_v41 = vsub.f32 %v130_v24, %v208_v40  ;;  %v111_v24 = vld [vmem:[#allocation7 + $0x30] sm:$0xff] }
 0x10f   :  { %546 = vmatpush.msrb.mxu3 %v111_v24 }
 0x110   :  { %v238_v42 = vmul.f32 1.442695, %v230_v41  ;;  %v406_v41 = vld [vmem:[#allocation8] sm:$0xff] }
 0x111   :  { %vm414_vm5 = vcmp.ge.f32.partialorder %v406_v41, 0.1 }
 0x112   :  { %598 = vpow2.f32 %v238_v42 }
 0x114   :  { %v220_v43 = vpop.xlane.xlu0 %219 }
 0x115   :  { %v234_v44 = vsub.f32 %v176_v27, %v220_v43  ;;  %v214_v45 = vpop.xlane.xlu1 %213 }
 0x116   :  { %v232_v47 = vsub.f32 %v153_v26, %v214_v45 }
 0x117   :  { %v246_v46 = vmul.f32 1.442695, %v234_v44 }
 0x118   :  { %v822_v48 = vpop.eup %598  ;;  %v242_v50 = vmul.f32 1.442695, %v232_v47  ;;  %v410_v47 = vld [vmem:[#allocation8 + $0x20] sm:$0xff] }
 0x119   :  { %600 = vpow2.f32 %v246_v46  ;;  %v254_v49 = vsel %vm205_vm0, %v822_v48, 0.0  ;;  %vm418_vm8 = vcmp.ge.f32.partialorder %v410_v47, 0.1 }
 0x11a   :  { %255 = vadd.xlane.f32.xlu1 %v254_v49  ;;  %602 = vpow2.f32 %v242_v50 }
 0x11c   :  { %v226_v51 = vpop.xlane.xlu0 %225  ;;  %v223_v52 = vpop.xlane.xlu2 %222 }
 0x11d   :  { %v236_v53 = vsub.f32 %v199_v30, %v226_v51  ;;  %v235_v56 = vsub.f32 %v179_v33, %v223_v52  ;;  %v217_v59 = vpop.xlane.xlu1 %216 }
 0x11e   :  { %v233_v2 = vsub.f32 %v156_v31, %v217_v59 }
 0x11f   :  { %v826_v54 = vpop.eup %600  ;;  %v250_v55 = vmul.f32 1.442695, %v236_v53  ;;  %v248_v58 = vmul.f32 1.442695, %v235_v56 }
 0x120   :  { %v266_v57 = vsel %vm205_vm0, %v826_v54, 0.0  ;;  %v830_v62 = vpop.eup %602  ;;  %v244_v7 = vmul.f32 1.442695, %v233_v2 }
 0x121   :  { %604 = vpow2.f32 %v250_v55  ;;  %267 = vadd.xlane.f32.xlu2 %v266_v57  ;;  %v260_v5 = vsel %vm205_vm0, %v830_v62, 0.0 }
 0x122   :  { %606 = vpow2.f32 %v248_v58 }
 0x124   :  { %v229_v60 = vpop.xlane.xlu2 %228  ;;  %v211_v61 = vpop.xlane.xlu0 %210 }
 0x125   :  { %v237_v63 = vsub.f32 %v202_v37, %v229_v60  ;;  %v231_v0 = vsub.f32 %v133_v36, %v211_v61 }
 0x127   :  { %v832_v1 = vpop.eup %604  ;;  %v252_v3 = vmul.f32 1.442695, %v237_v63  ;;  %v240_v4 = vmul.f32 1.442695, %v231_v0 }
 0x128   :  { %v272_v6 = vsel %vm205_vm0, %v832_v1, 0.0  ;;  %v838_v8 = vpop.eup %606 }
 0x129   :  { %608 = vpow2.f32 %v252_v3  ;;  %261 = vadd.xlane.f32.xlu2 %v260_v5  ;;  %273 = vadd.xlane.f32.xlu0 %v272_v6  ;;  %v269_v12 = vsel %vm205_vm0, %v838_v8, 0.0  ;;  %v408_v6 = vld [vmem:[#allocation8 + $0x10] sm:$0xff] }
 0x12a   :  { %610 = vpow2.f32 %v240_v4  ;;  %vm416_vm11 = vcmp.ge.f32.partialorder %v408_v6, 0.1 }
 0x12b   :  { %612 = vpow2.f32 %v244_v7  ;;  %v875_v7 = vld [vmem:[#allocation8 + $0x30] sm:$0xff] }
 0x12c   :  { %vm420_vm12 = vcmp.ge.f32.partialorder %v875_v7, 0.1 }
 0x12f   :  { %v840_v9 = vpop.eup %608 }
 0x130   :  { %v842_v10 = vpop.eup %610  ;;  %v275_v11 = vsel %vm205_vm0, %v840_v9, 0.0 }
 0x131   :  { %276 = vadd.xlane.f32.xlu1 %v275_v11  ;;  %270 = vadd.xlane.f32.xlu0 %v269_v12  ;;  %v257_v13 = vsel %vm205_vm0, %v842_v10, 0.0  ;;  %v850_v14 = vpop.eup %612 }
 0x132   :  { %258 = vadd.xlane.f32.xlu2 %v257_v13  ;;  %v263_v15 = vsel %vm205_vm0, %v850_v14, 0.0 }
 0x139   :  { %264 = vadd.xlane.f32.xlu0 %v263_v15 }
 0x18d   :  { %v256_v20 = vpop.xlane.xlu1 %255 }
 0x18e   :  { %v278_v21 = vmul.f32 0.9, %v256_v20 }
 0x190   :  { %614 = vrcp.f32 %v278_v21  ;;  %v295_v31 = vand.u32 2147483647, %v278_v21  ;;  %v297_v32 = vand.u32 2147483648, %v278_v21  ;;  %vm291_vm2 = vweird.f32 %v278_v21 }
 0x192   :  { %vm296_vm4 = vcmp.eq.f32.partialorder %v295_v31, 8.507059e+37  ;;  %v298_v42 = vor.u32 1.1754944e-38, %v297_v32 }
 0x194   :  { %v268_v26 = vpop.xlane.xlu2 %267 }
 0x195   :  { %v282_v27 = vmul.f32 0.9, %v268_v26 }
 0x196   :  { %v615_v28 = vpop.eup %614 }
 0x197   :  { %616 = vrcp.f32 %v282_v27  ;;  %v287_v29 = vmul.f32 %v615_v28, %v278_v21  ;;  %vm292_vm1 = vweird.f32 %v615_v28  ;;  %v355_v43 = vand.u32 2147483647, %v282_v27 }
 0x198   :  { %vm293_vm3 = vmor %vm291_vm2, %vm292_vm1  ;;  %v357_v46 = vand.u32 2147483648, %v282_v27  ;;  %vm351_vm7 = vweird.f32 %v282_v27 }
 0x199   :  { %v288_v30 = vsub.f32 1.0, %v287_v29  ;;  %vm861_vm9 = vcmp.eq.f32.partialorder %v355_v43, 8.507059e+37 }
 0x19a   :  { %v358_v58 = vor.u32 1.1754944e-38, %v357_v46 }
 0x19b   :  { %v289_v35 = vmul.f32 %v615_v28, %v288_v30 }
 0x19c   :  { %v262_v33 = vpop.xlane.xlu2 %261  ;;  %v274_v34 = vpop.xlane.xlu0 %273 }
 0x19d   :  { %v617_v36 = vpop.eup %616  ;;  %v854_v37 = vmul.f32 0.9, %v262_v33  ;;  %v856_v38 = vmul.f32 0.9, %v274_v34  ;;  %v290_v40 = vadd.f32 %v615_v28, %v289_v35  ;;  %v912_v34 = vld [vmem:[#allocation8 + $0x8] sm:$0xff] }
 0x19e   :  { %v347_v39 = vmul.f32 %v617_v36, %v282_v27  ;;  %vm352_vm6 = vweird.f32 %v617_v36  ;;  %v899_v27 = vld [vmem:[#allocation8 + $0x38] sm:$0xff] }
 0x19f   :  { %618 = vrcp.f32 %v854_v37  ;;  %v294_v45 = vsel %vm293_vm3, %v615_v28, %v290_v40  ;;  %vm353_vm10 = vmor %vm351_vm7, %vm352_vm6  ;;  %v327_v5 = vand.u32 2147483648, %v854_v37  ;;  %v385_v13 = vand.u32 2147483647, %v856_v38  ;;  %v411_v40 = vld [vmem:[#allocation8 + $0x28] sm:$0xff] }
 0x1a0   :  { %v348_v44 = vsub.f32 1.0, %v347_v39  ;;  %620 = vrcp.f32 %v856_v38  ;;  %v299_v49 = vsel %vm296_vm4, %v298_v42, %v294_v45  ;;  %v387_v17 = vand.u32 2147483648, %v856_v38 }
 0x1a1   :  { %v422_v50 = vmul.f32 %v822_v48, %v299_v49  ;;  %v325_v48 = vand.u32 2147483647, %v854_v37  ;;  %vm321_vm13 = vweird.f32 %v854_v37  ;;  %vm381_vm1 = vweird.f32 %v856_v38 }
 0x1a2   :  { %v349_v51 = vmul.f32 %v617_v36, %v348_v44  ;;  %v328_v24 = vor.u32 1.1754944e-38, %v327_v5  ;;  %vm895_vm3 = vcmp.eq.f32.partialorder %v385_v13, 8.507059e+37  ;;  %v388_v26 = vor.u32 1.1754944e-38, %v387_v17 }
 0x1a3   :  { %v430_v55 = vsel %vm414_vm5, %v422_v50, 0.0  ;;  %vm890_vm15 = vcmp.eq.f32.partialorder %v325_v48, 8.507059e+37 }
 0x1a4   :  { %v277_v52 = vpop.xlane.xlu1 %276  ;;  %v271_v53 = vpop.xlane.xlu0 %270  ;;  %v350_v56 = vadd.f32 %v617_v36, %v349_v51  ;;  %583 = vmatmul.msk.f32.vlgmr.msrb.gmra.mxu0 %vm205_vm0, %v430_v55 }
 0x1a5   :  { %v619_v59 = vpop.eup %618  ;;  %v865_v60 = vmul.f32 0.9, %v277_v52  ;;  %v259_v61 = vpop.xlane.xlu2 %258  ;;  %v867_v63 = vmul.f32 0.9, %v271_v53 }
 0x1a6   :  { %v621_v0 = vpop.eup %620  ;;  %v317_v2 = vmul.f32 %v619_v59, %v854_v37  ;;  %v872_v3 = vmul.f32 0.9, %v259_v61  ;;  %v354_v4 = vsel %vm353_vm10, %v617_v36, %v350_v56  ;;  %vm322_vm14 = vweird.f32 %v619_v59 }
 0x1a7   :  { %v377_v11 = vmul.f32 %v621_v0, %v856_v38  ;;  %622 = vrcp.f32 %v865_v60  ;;  %v359_v12 = vsel %vm861_vm9, %v358_v58, %v354_v4  ;;  %vm382_vm2 = vweird.f32 %v621_v0  ;;  %vm905_vm4 = vmor %vm321_vm13, %vm322_vm14 }
 0x1a8   :  { %v318_v15 = vsub.f32 1.0, %v317_v2  ;;  %624 = vrcp.f32 %v872_v3  ;;  %v426_v16 = vmul.f32 %v826_v54, %v359_v12  ;;  %vm306_vm5 = vweird.f32 %v872_v3  ;;  %vm383_vm6 = vmor %vm381_vm1, %vm382_vm2 }
 0x1a9   :  { %v378_v18 = vsub.f32 1.0, %v377_v11  ;;  %626 = vrcp.f32 %v867_v63  ;;  %v310_v32 = vand.u32 2147483647, %v872_v3  ;;  %v312_v33 = vand.u32 2147483648, %v872_v3 }
 0x1aa   :  { %v434_v19 = vsel %vm418_vm8, %v426_v16, 0.0  ;;  %v319_v20 = vmul.f32 %v619_v59, %v318_v15  ;;  %vm366_vm7 = vweird.f32 %v867_v63  ;;  %v370_v37 = vand.u32 2147483647, %v867_v63 }
 0x1ab   :  { %587 = vmatmul.msk.f32.vlgmr.msrb.gmra.mxu2 %vm205_vm0, %v434_v19  ;;  %v379_v54 = vmul.f32 %v621_v0, %v378_v18  ;;  %vm421_vm8 = vcmp.ge.f32.partialorder %v899_v27, 0.1  ;;  %vm415_vm9 = vcmp.ge.f32.partialorder %v912_v34, 0.1  ;;  %vm419_vm10 = vcmp.ge.f32.partialorder %v411_v40, 0.1 }
 0x1ac   :  { %v265_v22 = vpop.xlane.xlu0 %264  ;;  %v320_v23 = vadd.f32 %v619_v59, %v319_v20  ;;  %v400_v51 = vand.u32 2147483647, %v865_v60  ;;  %v402_v52 = vand.u32 2147483648, %v865_v60  ;;  %v372_v58 = vand.u32 2147483648, %v867_v63 }
 0x1ad   :  { %v623_v28 = vpop.eup %622  ;;  %v901_v29 = vmul.f32 0.9, %v265_v22  ;;  %v380_v31 = vadd.f32 %v621_v0, %v379_v54  ;;  %vm396_vm1 = vweird.f32 %v865_v60  ;;  %v409_v22 = vld [vmem:[#allocation8 + $0x18] sm:$0xff] }
 0x1ae   :  { %v625_v35 = vpop.eup %624  ;;  %v392_v36 = vmul.f32 %v623_v28, %v865_v60  ;;  %v324_v39 = vsel %vm905_vm4, %v619_v59, %v320_v23  ;;  %vm397_vm13 = vweird.f32 %v623_v28  ;;  %v403_v2 = vor.u32 1.1754944e-38, %v402_v52 }
 0x1af   :  { %v627_v41 = vpop.eup %626  ;;  %v302_v42 = vmul.f32 %v625_v35, %v872_v3  ;;  %628 = vrcp.f32 %v901_v29  ;;  %v329_v43 = vsel %vm890_vm15, %v328_v24, %v324_v39  ;;  %v384_v44 = vsel %vm383_vm6, %v621_v0, %v380_v31  ;;  %vm398_vm2 = vmor %vm396_vm1, %vm397_vm13 }
 0x1b0   :  { %v393_v45 = vsub.f32 1.0, %v392_v36  ;;  %v362_v38 = vmul.f32 %v627_v41, %v867_v63  ;;  %v424_v46 = vmul.f32 %v830_v62, %v329_v43  ;;  %v389_v47 = vsel %vm895_vm3, %v388_v26, %v384_v44 }
 0x1b1   :  { %v303_v49 = vsub.f32 1.0, %v302_v42  ;;  %v428_v50 = vmul.f32 %v832_v1, %v389_v47  ;;  %vm307_vm14 = vweird.f32 %v625_v35  ;;  %vm367_vm15 = vweird.f32 %v627_v41 }
 0x1b2   :  { %v363_v53 = vsub.f32 1.0, %v362_v38  ;;  %v432_v55 = vsel %vm416_vm11, %v424_v46, 0.0  ;;  %v394_v56 = vmul.f32 %v623_v28, %v393_v45  ;;  %vm311_vm11 = vcmp.eq.f32.partialorder %v310_v32, 8.507059e+37  ;;  %vm368_vm4 = vmor %vm366_vm7, %vm367_vm15 }
 0x1b3   :  { %585 = vmatmul.msk.f32.vlgmr.msrb.gmra.mxu1 %vm205_vm0, %v432_v55  ;;  %v436_v62 = vsel %vm420_vm12, %v428_v50, 0.0  ;;  %v304_v57 = vmul.f32 %v625_v35, %v303_v49  ;;  %v313_v0 = vor.u32 1.1754944e-38, %v312_v33  ;;  %vm308_vm12 = vmor %vm306_vm5, %vm307_vm14  ;;  %vm401_vm3 = vcmp.eq.f32.partialorder %v400_v51, 8.507059e+37 }
 0x1b4   :  { %589 = vmatmul.msk.f32.vlgmr.msrb.gmra.mxu3 %vm205_vm0, %v436_v62  ;;  %v364_v1 = vmul.f32 %v627_v41, %v363_v53  ;;  %v395_v59 = vadd.f32 %v623_v28, %v394_v56  ;;  %vm371_vm6 = vcmp.eq.f32.partialorder %v370_v37, 8.507059e+37  ;;  %v373_v60 = vor.u32 1.1754944e-38, %v372_v58 }
 0x1b5   :  { %v629_v61 = vpop.eup %628  ;;  %v305_v48 = vadd.f32 %v625_v35, %v304_v57  ;;  %v340_v18 = vand.u32 2147483647, %v901_v29  ;;  %v342_v19 = vand.u32 2147483648, %v901_v29  ;;  %vm336_vm7 = vweird.f32 %v901_v29 }
 0x1b6   :  { %v332_v4 = vmul.f32 %v629_v61, %v901_v29  ;;  %v365_v5 = vadd.f32 %v627_v41, %v364_v1  ;;  %v399_v6 = vsel %vm398_vm2, %v623_v28, %v395_v59  ;;  %vm337_vm5 = vweird.f32 %v629_v61 }
 0x1b7   :  { %v309_v7 = vsel %vm308_vm12, %v625_v35, %v305_v48  ;;  %v404_v11 = vsel %vm401_vm3, %v403_v2, %v399_v6  ;;  %vm338_vm13 = vmor %vm336_vm7, %vm337_vm5  ;;  %vm417_vm14 = vcmp.ge.f32.partialorder %v409_v22, 0.1 }
 0x1b8   :  { %v333_v12 = vsub.f32 1.0, %v332_v4  ;;  %v314_v13 = vsel %vm311_vm11, %v313_v0, %v309_v7  ;;  %v369_v15 = vsel %vm368_vm4, %v627_v41, %v365_v5  ;;  %v429_v16 = vmul.f32 %v840_v9, %v404_v11 }
 0x1b9   :  { %v423_v17 = vmul.f32 %v842_v10, %v314_v13  ;;  %v374_v3 = vsel %vm371_vm6, %v373_v60, %v369_v15 }
 0x1ba   :  { %v427_v20 = vmul.f32 %v838_v8, %v374_v3  ;;  %v437_v63 = vsel %vm421_vm8, %v429_v16, 0.0  ;;  %v334_v21 = vmul.f32 %v629_v61, %v333_v12  ;;  %v343_v8 = vor.u32 1.1754944e-38, %v342_v19 }
 0x1bb   :  { %v431_v54 = vsel %vm415_vm9, %v423_v17, 0.0  ;;  %vm341_vm8 = vcmp.eq.f32.partialorder %v340_v18, 8.507059e+37 }
 0x1bc   :  { %584 = vmatmul.msk.f32.gmra.mxu0 %vm205_vm0, %v431_v54  ;;  %v435_v9 = vsel %vm419_vm10, %v427_v20, 0.0  ;;  %590 = vmatmul.msk.f32.gmra.mxu3 %vm205_vm0, %v437_v63  ;;  %v335_v10 = vadd.f32 %v629_v61, %v334_v21 }
 0x1bd   :  { %588 = vmatmul.msk.f32.gmra.mxu2 %vm205_vm0, %v435_v9 }
 0x1be   :  { %v339_v23 = vsel %vm338_vm13, %v629_v61, %v335_v10 }
 0x1bf   :  { %v344_v24 = vsel %vm341_vm8, %v343_v8, %v339_v23 }
 0x1c0   :  { %v425_v25 = vmul.f32 %v850_v14, %v344_v24 }
 0x1c2   :  { %v433_v26 = vsel %vm417_vm14, %v425_v25, 0.0 }
 0x1c3   :  { %586 = vmatmul.msk.f32.gmra.mxu1 %vm205_vm0, %v433_v26 }
 0x221   :  { %v461_v27 = vpop.f32.mrf.mxu0 }
 0x222   :  { %554 = vst [vmem:[#allocation10] sm:$0xff] %v461_v27 }
 0x22e   :  { %v519_v28 = vpop.f32.mrf.mxu2 }
 0x22f   :  { %558 = vst [vmem:[#allocation10 + $0x20] sm:$0xff] %v519_v28 }
 0x230   :  { %v490_v30 = vpop.f32.mrf.mxu1 }
 0x231   :  { %556 = vst [vmem:[#allocation10 + $0x10] sm:$0xff] %v490_v30 }
 0x237   :  { %v548_v29 = vpop.f32.mrf.mxu3 }
 0x238   :  { %560 = vst [vmem:[#allocation10 + $0x30] sm:$0xff] %v548_v29 }
 0x239   :  { %v464_v31 = vpop.f32.mrf.mxu0 }
 0x23a   :  { %555 = vst [vmem:[#allocation10 + $0x8] sm:$0xff] %v464_v31 }
 0x23f   :  { %v551_v14 = vpop.f32.mrf.mxu3 }
 0x240   :  { %v522_v32 = vpop.f32.mrf.mxu2  ;;  %561 = vst [vmem:[#allocation10 + $0x38] sm:$0xff] %v551_v14  ;;  %v493_v33 = vpop.f32.mrf.mxu1 }
 0x241   :  { %559 = vst [vmem:[#allocation10 + $0x28] sm:$0xff] %v522_v32 }
 0x242   :  { %557 = vst [vmem:[#allocation10 + $0x18] sm:$0xff] %v493_v33 }
 0x243   :  { %574 = dma.vmem_to_hbm [thread:$0]  %s567_s8, 1024, %s569_s11, [#allocation4], %s759_s23, %s759_s23, %s760_s24  }
 0x244   :  { %756 = dma.done.wait [#allocation4], 1024  }
 0x245   :  { %757 = vsyncadd [#allocation4], 4294966272 }
 0x246   :  { %579 = vsyncpa [#allocation3], 1 }
 0x247   :  { %580 = vsyncpa [#allocation6], 1 }
 0x248   :  { %581 = vsyncpa [#allocation9], 1 }
 0x249   :  { %582 = vsyncpa [#allocation4], 1 }

</bundles_post_ra>
